<compile_context>
chip_gen: v6e
topology: v6e:2x2x1
jax: 0.10.0
libtpu: 0.0.40
codegen_flags: <defaults>
</compile_context>

<pallas_src>
import functools
import math

import jax
import jax.numpy as jnp
from jax import lax
from jax.experimental import pallas as pl
from jax.experimental.pallas import tpu as pltpu


# ----------------------------- hardware queries ------------------------------

def _device_kind():
    try:
        return jax.devices()[0].device_kind.lower()
    except Exception:
        return ""


def _tpu_info():
    try:
        return pltpu.get_tpu_info()
    except Exception:
        return None


def _num_tensorcores():
    info = _tpu_info()
    if info is not None:
        for attr in ("num_cores", "core_count", "tensorcore_count", "num_tensorcores"):
            n = getattr(info, attr, None)
            if isinstance(n, int) and n > 0:
                return n
    kind = _device_kind()
    # v7x has 2 TensorCores per chip (v4/v5p megacore behaves similarly);
    # v5e/v6e have a single TensorCore.
    if any(tag in kind for tag in ("v7", "v4", "v5p")):
        return 2
    return 1


def _vmem_limit_bytes():
    info = _tpu_info()
    cap = getattr(info, "vmem_capacity_bytes", None) if info is not None else None
    if isinstance(cap, int) and cap > 0:
        # Half of physical VMEM, capped at 64 MiB: 64 MiB on v5e/v6e (128 MiB
        # physical), 32 MiB on v7x (64 MiB physical).
        return max(16 << 20, min(cap // 2, 64 << 20))
    return 32 << 20  # safe everywhere


def _default_use_bf16():
    # v5e's MXU is bf16-native; its f32 matmul path is multi-pass emulation.
    kind = _device_kind()
    return ("v5e" in kind) or ("v5 lite" in kind) or ("v5lite" in kind)


# --------------------------------- kernel ------------------------------------

def _mutual_attention_kernel(q_ref, k_ref, w_ref, b_ref, o_ref, *,
                             compute_dtype, approx_recip):
    Bt, S, W = q_ref.shape
    M = Bt * S

    # ---- fused projections: one (2*M, W) x (2W, W) MXU matmul ---------------
    # nn.Linear semantics (y = x @ W.T + b) via last-dim-vs-last-dim contraction;
    # the (out, in) weight layout is used as-is (no weight transpose).
    x_in = jnp.concatenate(
        [q_ref[...].reshape(M, W), k_ref[...].reshape(M, W)], axis=0
    ).astype(compute_dtype)
    w = w_ref[...].astype(compute_dtype)                  # (2W, W) = [wq; wk]
    dn_proj = (((1,), (1,)), ((), ()))
    proj = lax.dot_general(x_in, w, dn_proj, preferred_element_type=jnp.float32)
    q = (proj[:M, :W] + b_ref[0:1, :]).reshape(Bt, S, W)   # query @ wq.T + bq
    k = (proj[M:, W:] + b_ref[1:2, :]).reshape(Bt, S, W)   # key   @ wk.T + bk

    # Cast once; reuse both as QK^T operands and as the PV "value" operands.
    q_c = q.astype(compute_dtype)
    k_c = k.astype(compute_dtype)

    # scores[b, i, j] = <q_i, k_j> / sqrt(d_k).  The scores of
    # attention(key, query, key) are exactly scores^T, so one QK^T matmul
    # serves both attentions.
    dn_qk = (((2,), (2,)), ((0,), (0,)))
    scores = lax.dot_general(q_c, k_c, dn_qk,
                             preferred_element_type=jnp.float32)
    scores = scores * (1.0 / math.sqrt(W))   # S*S mults (< S*W at these shapes)

    dn_pv = (((2,), (1,)), ((0,), (0,)))

    # x1 = softmax_j(scores) @ q
    m1 = jnp.max(scores, axis=-1, keepdims=True)
    e1 = jnp.exp(scores - m1)
    p1 = e1 * pl.reciprocal(jnp.sum(e1, axis=-1, keepdims=True),
                            approx=approx_recip)            # EUP, not VALU divide
    x1 = lax.dot_general(p1.astype(compute_dtype), q_c, dn_pv,
                         preferred_element_type=jnp.float32)

    # x2 = softmax_j(scores^T) @ k.  The softmax runs along axis=-2 of the same
    # score matrix, so no transposed f32 scores copy is materialized; only the
    # compute-dtype probabilities are transposed (cheap XLU) for the PV matmul.
    m2 = jnp.max(scores, axis=-2, keepdims=True)
    e2 = jnp.exp(scores - m2)
    p2 = e2 * pl.reciprocal(jnp.sum(e2, axis=-2, keepdims=True),
                            approx=approx_recip)
    p2t = jnp.swapaxes(p2.astype(compute_dtype), -1, -2)
    x2 = lax.dot_general(p2t, k_c, dn_pv, preferred_element_type=jnp.float32)

    # ---- lane-dense stores ---------------------------------------------------
    # o_ref block is (1, Bt, 2*S*W); the last dim (2*S*W lanes, multiple of 128
    # here) makes both stores unmasked full-lane vst, and the S*W split point is
    # lane-tile aligned.
    SW = S * W
    o_ref[0, :, :SW] = x1.reshape(Bt, SW).astype(o_ref.dtype)
    o_ref[0, :, SW:] = x2.reshape(Bt, SW).astype(o_ref.dtype)


# -------------------------------- wrapper -------------------------------------

def _choose_block_b(B, S, W, use_bf16, num_cores, vmem_budget, in_itemsize):
    # MXU M-dim target for the fused projection (M = 2*block_b*S rows):
    # 256 keeps the 256-wide MXUs of v6e/v7x full on the bf16 path.
    m_target = 256 if use_bf16 else 128
    bb = max(1, m_target // max(1, 2 * S))
    # VMEM-aware cap: f32 intermediates (scores/exp/probs ~ S*S, projections and
    # values ~ S*W) plus double-buffered input/output blocks, with 2x headroom.
    per_b = 4 * (8 * S * S + 16 * S * W) + in_itemsize * 8 * S * W
    bb = max(1, min(bb, vmem_budget // max(1, 2 * per_b)))
    bb = min(bb, B)
    steps = pl.cdiv(B, bb)
    if num_cores > 1 and B >= num_cores:
        # Keep the grid a multiple of the TensorCore count so the "parallel"
        # axis gives every core work; on single-TC chips a single step is best.
        steps = pl.cdiv(max(steps, num_cores), num_cores) * num_cores
        bb = pl.cdiv(B, steps)
    return bb, steps


def mutual_attention(query, key, wq, bq, wk, bk, *, block_b=None, use_bf16=None,
                     approx_recip=True):
    """Pallas MutualAttention forward.

    query, key : (B, S, W)
    wq, wk     : (W, W) nn.Linear weights, PyTorch (out_features, in_features) layout
    bq, bk     : (1, W) biases
    returns    : (B, 2*S, W) == torch.cat((attn(q,k,q), attn(k,q,k)), dim=1)

    use_bf16:     MXU operands in bf16 with f32 accumulation (None = auto: True
                  on v5e where f32 matmul is emulated, False elsewhere).
    approx_recip: EUP approximate reciprocal for the softmax normalization
                  (independent of use_bf16; pass False for tight f32 parity).
    """
    B, S, W = query.shape
    assert key.shape == (B, S, W)
    assert wq.shape == (W, W) and wk.shape == (W, W)

    if use_bf16 is None:
        use_bf16 = _default_use_bf16()
    compute_dtype = jnp.bfloat16 if use_bf16 else jnp.float32

    num_cores = _num_tensorcores()
    vmem_limit = _vmem_limit_bytes()

    if block_b is None:
        block_b, steps = _choose_block_b(
            B, S, W, use_bf16, num_cores, vmem_limit,
            jnp.dtype(query.dtype).itemsize)
    else:
        steps = pl.cdiv(B, block_b)

    # Pad awkward batch sizes instead of letting block_b collapse to 1
    # (each extra grid step costs ~0.35 us of pipeline overhead).
    B_pad = steps * block_b
    if B_pad != B:
        pad = B_pad - B
        query = jnp.pad(query, ((0, pad), (0, 0), (0, 0)))
        key = jnp.pad(key, ((0, pad), (0, 0), (0, 0)))

    # Fuse the two Linear layers' parameters so the kernel does one MXU matmul.
    w_fused = jnp.concatenate([wq, wk], axis=0).astype(query.dtype)    # (2W, W)
    b_fused = jnp.concatenate([bq.reshape(1, W), bk.reshape(1, W)],
                              axis=0).astype(jnp.float32)              # (2, W)

    kernel = functools.partial(_mutual_attention_kernel,
                               compute_dtype=compute_dtype,
                               approx_recip=approx_recip)

    # TODO(synk): for large S (sooner on v7x's 64 MiB VMEM), switch to a
    # flash-style (tq, tk) grid with online softmax instead of materializing
    # the (block_b, S, S) score matrices.
    out = pl.pallas_call(
        kernel,
        # Rank-3 lane-dense output: last dim 2*S*W (multiple of 128 lanes), and
        # the last two block dims equal the array dims so any block_b satisfies
        # the (8, 128) BlockSpec constraint.
        out_shape=jax.ShapeDtypeStruct((steps, block_b, 2 * S * W), query.dtype),
        grid=(steps,),
        in_specs=[
            pl.BlockSpec((block_b, S, W), lambda b: (b, 0, 0)),   # query
            pl.BlockSpec((block_b, S, W), lambda b: (b, 0, 0)),   # key
            pl.BlockSpec((2 * W, W), lambda b: (0, 0)),           # [wq; wk]
            pl.BlockSpec((2, W), lambda b: (0, 0)),               # [bq; bk]
        ],
        out_specs=pl.BlockSpec((1, block_b, 2 * S * W), lambda b: (b, 0, 0)),
        compiler_params=pltpu.CompilerParams(
            dimension_semantics=("parallel",),
            vmem_limit_bytes=vmem_limit),
    )(query, key, w_fused, b_fused)

    # (steps, block_b, 2*S*W) -> (B_pad, 2*S, W) -> drop padded batch rows.
    return out.reshape(B_pad, 2 * S, W)[:B]


def mutual_attention_ref(query, key, wq, bq, wk, bk):
    # Pure-JAX reference mirroring the PyTorch forward.
    q = query @ wq.T + bq.reshape(-1)
    k = key @ wk.T + bk.reshape(-1)
    d_k = q.shape[-1]

    def attn(a, b, v):
        scores = jnp.einsum("bik,bjk->bij", a, b) / math.sqrt(d_k)
        p = jax.nn.softmax(scores, axis=-1)
        return jnp.einsum("bij,bjd->bid", p, v)

    return jnp.concatenate([attn(q, k, q), attn(k, q, k)], axis=1)


if __name__ == "__main__":
    B, S, W = 4, 8, 32   # batch, seq, feature (w); h is unused in the forward

    root = jax.random.PRNGKey(0)
    kq, kk, kw0, kb0, kw1, kb1, kq2, kk2 = jax.random.split(root, 8)

    query = jax.random.normal(kq, (B, S, W), dtype=jnp.float32)
    key = jax.random.normal(kk, (B, S, W), dtype=jnp.float32)

    # Deterministic nn.Linear(w, w)-style init (uniform in +/- 1/sqrt(w)).
    bound = 1.0 / math.sqrt(W)
    wq = jax.random.uniform(kw0, (W, W), jnp.float32, -bound, bound)
    bq = jax.random.uniform(kb0, (1, W), jnp.float32, -bound, bound)
    wk = jax.random.uniform(kw1, (W, W), jnp.float32, -bound, bound)
    bk = jax.random.uniform(kb1, (1, W), jnp.float32, -bound, bound)

    ref = mutual_attention_ref(query, key, wq, bq, wk, bk)

    # f32 MXU path with exact (Newton-refined) reciprocal: tight parity.
    out = jax.block_until_ready(
        mutual_attention(query, key, wq, bq, wk, bk,
                         use_bf16=False, approx_recip=False))
    assert out.shape == (B, 2 * S, W)
    assert jnp.allclose(out, ref, atol=1e-5, rtol=1e-5), "f32 path mismatch"

    # bf16 MXU operands (f32 accumulation) + approx EUP reciprocal.
    out_bf16 = jax.block_until_ready(
        mutual_attention(query, key, wq, bq, wk, bk, use_bf16=True))
    assert jnp.allclose(out_bf16, ref, atol=5e-2, rtol=5e-2), "bf16 path mismatch"

    # Awkward batch size: exercises the pad-to-block path.
    B2 = 3
    query2 = jax.random.normal(kq2, (B2, S, W), dtype=jnp.float32)
    key2 = jax.random.normal(kk2, (B2, S, W), dtype=jnp.float32)
    ref2 = mutual_attention_ref(query2, key2, wq, bq, wk, bk)
    out2 = jax.block_until_ready(
        mutual_attention(query2, key2, wq, bq, wk, bk,
                         use_bf16=False, approx_recip=False))
    assert out2.shape == (B2, 2 * S, W)
    assert jnp.allclose(out2, ref2, atol=1e-5, rtol=1e-5), "padded-batch mismatch"

    print("KERNEL_OK")
</pallas_src>

<mosaic_0001>
module attributes {stable_mosaic.version = 11 : i64} {
  func.func @_mutual_attention_kernel(%arg0: i32, %arg1: memref<4x8x32xf32, #tpu.memory_space<vmem>>, %arg2: memref<4x8x32xf32, #tpu.memory_space<vmem>>, %arg3: memref<64x32xf32, #tpu.memory_space<vmem>>, %arg4: memref<2x32xf32, #tpu.memory_space<vmem>>, %arg5: memref<1x4x512xf32, #tpu.memory_space<vmem>>) attributes {dimension_semantics = [#tpu.dimension_semantics<parallel>], iteration_bounds = array<i64: 1>, scalar_prefetch = 0 : i64, scratch_operands = 0 : i64, tpu.core_type = #tpu.core_type<tc>, window_params = [{transform_indices = @transform_0, window_bounds = array<i64: 4, 8, 32>}, {transform_indices = @transform_1, window_bounds = array<i64: 4, 8, 32>}, {pipeline_mode = #tpu.pipeline_mode<synchronous>, transform_indices = @transform_2, window_bounds = array<i64: 64, 32>}, {pipeline_mode = #tpu.pipeline_mode<synchronous>, transform_indices = @transform_3, window_bounds = array<i64: 2, 32>}, {transform_indices = @transform_4, window_bounds = array<i64: 1, 4, 512>}]} {
    %c0 = arith.constant 0 : index
    %c0_0 = arith.constant 0 : index
    %c0_1 = arith.constant 0 : index
    %0 = vector.load %arg1[%c0, %c0_0, %c0_1] : memref<4x8x32xf32, #tpu.memory_space<vmem>>, vector<4x8x32xf32>
    %1 = vector.shape_cast %0 : vector<4x8x32xf32> to vector<32x32xf32>
    %c0_2 = arith.constant 0 : index
    %c0_3 = arith.constant 0 : index
    %c0_4 = arith.constant 0 : index
    %2 = vector.load %arg2[%c0_2, %c0_3, %c0_4] : memref<4x8x32xf32, #tpu.memory_space<vmem>>, vector<4x8x32xf32>
    %3 = vector.shape_cast %2 : vector<4x8x32xf32> to vector<32x32xf32>
    %4 = tpu.concatenate %1, %3 in 0 : vector<32x32xf32>, vector<32x32xf32> -> vector<64x32xf32>
    %c0_5 = arith.constant 0 : index
    %c0_6 = arith.constant 0 : index
    %5 = vector.load %arg3[%c0_5, %c0_6] : memref<64x32xf32, #tpu.memory_space<vmem>>, vector<64x32xf32>
    %cst = arith.constant dense<0.000000e+00> : vector<64x64xf32>
    %6 = tpu.matmul %4, %5, %cst {dimension_numbers = #tpu.dot_dimension_numbers<[1], [1], [0], [0], [0, 0, 1, 0], [], []>} : vector<64x32xf32>, vector<64x32xf32>, vector<64x64xf32> -> vector<64x64xf32>
    %7 = vector.extract_strided_slice %6 {offsets = [0, 0], sizes = [32, 32], strides = [1, 1]} : vector<64x64xf32> to vector<32x32xf32>
    %c0_7 = arith.constant 0 : index
    %c0_8 = arith.constant 0 : index
    %8 = vector.load %arg4[%c0_7, %c0_8] : memref<2x32xf32, #tpu.memory_space<vmem>>, vector<1x32xf32>
    %9 = vector.broadcast %8 : vector<1x32xf32> to vector<32x32xf32>
    %10 = arith.addf %7, %9 : vector<32x32xf32>
    %11 = vector.shape_cast %10 : vector<32x32xf32> to vector<4x8x32xf32>
    %12 = vector.extract_strided_slice %6 {offsets = [32, 32], sizes = [32, 32], strides = [1, 1]} : vector<64x64xf32> to vector<32x32xf32>
    %c1 = arith.constant 1 : index
    %c0_9 = arith.constant 0 : index
    %13 = vector.load %arg4[%c1, %c0_9] : memref<2x32xf32, #tpu.memory_space<vmem>>, vector<1x32xf32>
    %14 = vector.broadcast %13 : vector<1x32xf32> to vector<32x32xf32>
    %15 = arith.addf %12, %14 : vector<32x32xf32>
    %16 = vector.shape_cast %15 : vector<32x32xf32> to vector<4x8x32xf32>
    %cst_10 = arith.constant dense<0.000000e+00> : vector<4x8x8xf32>
    %17 = tpu.matmul %11, %16, %cst_10 {dimension_numbers = #tpu.dot_dimension_numbers<[2], [2], [1], [1], [0, 0, 0, 1, 1, 1], [0], [0]>} : vector<4x8x32xf32>, vector<4x8x32xf32>, vector<4x8x8xf32> -> vector<4x8x8xf32>
    %cst_11 = arith.constant 0.176776692 : f32
    %18 = vector.broadcast %cst_11 : f32 to vector<4x8x8xf32>
    %19 = arith.mulf %17, %18 : vector<4x8x8xf32>
    %cst_12 = arith.constant dense<0xFF800000> : vector<4x8xf32>
    %20 = vector.multi_reduction <maximumf>, %19, %cst_12 [2] : vector<4x8x8xf32> to vector<4x8xf32>
    %21 = vector.shape_cast %20 : vector<4x8xf32> to vector<4x8x1xf32>
    %22 = vector.broadcast %21 : vector<4x8x1xf32> to vector<4x8x8xf32>
    %23 = arith.subf %19, %22 : vector<4x8x8xf32>
    %24 = math.exp %23 : vector<4x8x8xf32>
    %cst_13 = arith.constant dense<0.000000e+00> : vector<4x8xf32>
    %25 = vector.multi_reduction <add>, %24, %cst_13 [2] : vector<4x8x8xf32> to vector<4x8xf32>
    %26 = vector.shape_cast %25 : vector<4x8xf32> to vector<4x8x1xf32>
    %27 = tpu.reciprocal %26 : vector<4x8x1xf32> -> vector<4x8x1xf32>
    %28 = vector.broadcast %27 : vector<4x8x1xf32> to vector<4x8x8xf32>
    %29 = arith.mulf %24, %28 : vector<4x8x8xf32>
    %cst_14 = arith.constant dense<0.000000e+00> : vector<4x8x32xf32>
    %30 = tpu.matmul %29, %11, %cst_14 {dimension_numbers = #tpu.dot_dimension_numbers<[2], [1], [1], [2], [0, 0, 0, 1, 1, 2], [0], [0]>} : vector<4x8x8xf32>, vector<4x8x32xf32>, vector<4x8x32xf32> -> vector<4x8x32xf32>
    %cst_15 = arith.constant dense<0xFF800000> : vector<4x8xf32>
    %31 = vector.multi_reduction <maximumf>, %19, %cst_15 [1] : vector<4x8x8xf32> to vector<4x8xf32>
    %32 = vector.shape_cast %31 : vector<4x8xf32> to vector<4x1x8xf32>
    %33 = vector.broadcast %32 : vector<4x1x8xf32> to vector<4x8x8xf32>
    %34 = arith.subf %19, %33 : vector<4x8x8xf32>
    %35 = math.exp %34 : vector<4x8x8xf32>
    %cst_16 = arith.constant dense<0.000000e+00> : vector<4x8xf32>
    %36 = vector.multi_reduction <add>, %35, %cst_16 [1] : vector<4x8x8xf32> to vector<4x8xf32>
    %37 = vector.shape_cast %36 : vector<4x8xf32> to vector<4x1x8xf32>
    %38 = tpu.reciprocal %37 : vector<4x1x8xf32> -> vector<4x1x8xf32>
    %39 = vector.broadcast %38 : vector<4x1x8xf32> to vector<4x8x8xf32>
    %40 = arith.mulf %35, %39 : vector<4x8x8xf32>
    %41 = tpu.transpose %40, [0, 2, 1] : vector<4x8x8xf32> -> vector<4x8x8xf32>
    %cst_17 = arith.constant dense<0.000000e+00> : vector<4x8x32xf32>
    %42 = tpu.matmul %41, %16, %cst_17 {dimension_numbers = #tpu.dot_dimension_numbers<[2], [1], [1], [2], [0, 0, 0, 1, 1, 2], [0], [0]>} : vector<4x8x8xf32>, vector<4x8x32xf32>, vector<4x8x32xf32> -> vector<4x8x32xf32>
    %43 = vector.shape_cast %30 : vector<4x8x32xf32> to vector<4x256xf32>
    %c0_18 = arith.constant 0 : index
    %c0_19 = arith.constant 0 : index
    %c0_20 = arith.constant 0 : index
    %44 = vector.load %arg5[%c0_18, %c0_19, %c0_20] : memref<1x4x512xf32, #tpu.memory_space<vmem>>, vector<1x4x256xf32>
    %45 = vector.shape_cast %44 : vector<1x4x256xf32> to vector<4x256xf32>
    %46 = vector.shape_cast %43 : vector<4x256xf32> to vector<1x4x256xf32>
    tpu.vector_store %arg5[%c0_18, %c0_19, %c0_20], %46 {strides = array<i32>} : memref<1x4x512xf32, #tpu.memory_space<vmem>>, vector<1x4x256xf32>,
    %47 = vector.shape_cast %42 : vector<4x8x32xf32> to vector<4x256xf32>
    %c0_21 = arith.constant 0 : index
    %c0_22 = arith.constant 0 : index
    %c256 = arith.constant 256 : index
    %48 = vector.load %arg5[%c0_21, %c0_22, %c256] : memref<1x4x512xf32, #tpu.memory_space<vmem>>, vector<1x4x256xf32>
    %49 = vector.shape_cast %48 : vector<1x4x256xf32> to vector<4x256xf32>
    %50 = vector.shape_cast %47 : vector<4x256xf32> to vector<1x4x256xf32>
    tpu.vector_store %arg5[%c0_21, %c0_22, %c256], %50 {strides = array<i32>} : memref<1x4x512xf32, #tpu.memory_space<vmem>>, vector<1x4x256xf32>,
    return
  }
  func.func @transform_0(%arg0: i32) -> (i32, i32, i32) {
    %c0_i32 = arith.constant 0 : i32
    %c0_i32_0 = arith.constant 0 : i32
    %c0_i32_1 = arith.constant 0 : i32
    return %arg0, %c0_i32, %c0_i32_0 : i32, i32, i32
  }
  func.func @transform_1(%arg0: i32) -> (i32, i32, i32) {
    %c0_i32 = arith.constant 0 : i32
    %c0_i32_0 = arith.constant 0 : i32
    %c0_i32_1 = arith.constant 0 : i32
    return %arg0, %c0_i32, %c0_i32_0 : i32, i32, i32
  }
  func.func @transform_2(%arg0: i32) -> (i32, i32) {
    %c0_i32 = arith.constant 0 : i32
    %c0_i32_0 = arith.constant 0 : i32
    %c0_i32_1 = arith.constant 0 : i32
    return %c0_i32, %c0_i32_0 : i32, i32
  }
  func.func @transform_3(%arg0: i32) -> (i32, i32) {
    %c0_i32 = arith.constant 0 : i32
    %c0_i32_0 = arith.constant 0 : i32
    %c0_i32_1 = arith.constant 0 : i32
    return %c0_i32, %c0_i32_0 : i32, i32
  }
  func.func @transform_4(%arg0: i32) -> (i32, i32, i32) {
    %c0_i32 = arith.constant 0 : i32
    %c0_i32_0 = arith.constant 0 : i32
    %c0_i32_1 = arith.constant 0 : i32
    return %arg0, %c0_i32, %c0_i32_0 : i32, i32, i32
  }
}

</mosaic_0001>

<bundles_post_ra>
// kernel: tpu_custom_call.1
= control target key start
LH: loop header
LB: loop body
LE: loop exit
PB: predicated region body
PF: predicated region fallthrough
CT: control target
= control target key end

     0   :  { %vm34_vm0 = vcmask 261120   ;;  %s2065_s0 = inlined_call_operand.vmem [shape: f32[4,8,32], index: 0, kind: input, shape index: {}]   ;;  %s2066_s1 = inlined_call_operand.vmem [shape: f32[4,8,32], index: 1, kind: input, shape index: {}]   ;;  %s2067_s2 = inlined_call_operand.vmem [shape: f32[64,32], index: 2, kind: input, shape index: {}]   ;;  %s2068_s3 = inlined_call_operand.vmem [shape: f32[2,32], index: 3, kind: input, shape index: {}]   ;;  %s2069_s4 = inlined_call_operand.hbm [shape: f32[1,4,512], index: 4, kind: output, shape index: {}]  }
   0x1   :  { %v33_v0 = vld [vmem:[%s2067_s2 + $0x38] sm:$0xff]  ;;  %v32_v1 = vld [vmem:[%s2067_s2 + $0x30] sm:$0xff]  ;;  %v18_v2 = vld [vmem:[%s2065_s0] sm:$0xff] }
   0x2   :  { %1655 = vmatprep.subr.msk.mxu0 %vm34_vm0, %v33_v0  ;;  %1671 = vmatprep.mubr.msk.f32.mxu0 %vm34_vm0, %v18_v2  ;;  %v31_v3 = vld [vmem:[%s2067_s2 + $0x28] sm:$0xff]  ;;  %v1598_v4 = vld [vmem:[%s2068_s3 + $0x1] ss:$0 sm:$0xff] }
   0x3   :  { %1656 = vmatpush3.xpose.msk.msra.mxu0 %vm34_vm0, %v33_v0 }
   0x4   :  { %1657 = vmatprep.subr.msk.mxu0 %vm34_vm0, %v32_v1 }
   0x5   :  { %9 = vsyncpa [#allocation3], 0  ;;  %s1805_s25 = smov 32   ;;  %v30_v5 = vld [vmem:[%s2067_s2 + $0x20] sm:$0xff]  ;;  %v29_v6 = vld [vmem:[%s2067_s2 + $0x18] sm:$0xff]  ;;  %v1806_v17 = vmov 0.0  }
   0x6   :  { %203 = vrot.lane.b32.xlu0 %v1598_v4, %s1805_s25  ;;  %v28_v7 = vld [vmem:[%s2067_s2 + $0x10] sm:$0xff]  ;;  %v27_v8 = vld [vmem:[%s2067_s2 + $0x8] sm:$0xff]  ;;  %v26_v9 = vld [vmem:[%s2067_s2] sm:$0xff]  ;;  %1683 = vmatprep.subr.mxu1 %v1806_v17  ;;  %vm1807_vm1 = vmmov 0   ;;  %vm526_vm2 = vcmask 64512   ;;  %vm1452_vm3 = vcmask 523264  }
   0x7   :  { %1658 = vmatpush3.xpose.msk.msra.mxu0 %vm34_vm0, %v32_v1  ;;  %v19_v10 = vld [vmem:[%s2065_s0 + $0x8] sm:$0xff]  ;;  %v20_v11 = vld [vmem:[%s2065_s0 + $0x10] sm:$0xff]  ;;  %v21_v12 = vld [vmem:[%s2065_s0 + $0x18] sm:$0xff]  ;;  %1685 = vmatprep.mubr.msk.f32.mxu1 %vm1807_vm1, %v1806_v17  ;;  %vm1454_vm4 = vcmask 785408   ;;  %s1812_s24 = smov [#allocation2]  }
   0x8   :  { %1659 = vmatprep.subr.msk.mxu0 %vm34_vm0, %v31_v3  ;;  %v22_v13 = vld [vmem:[%s2066_s1] sm:$0xff]  ;;  %v23_v14 = vld [vmem:[%s2066_s1 + $0x8] sm:$0xff]  ;;  %v24_v15 = vld [vmem:[%s2066_s1 + $0x10] sm:$0xff] }
   0x9   :  { %v25_v16 = vld [vmem:[%s2066_s1 + $0x18] sm:$0xff]  ;;  %s1808_s1 = smov 96   ;;  %v1597_v32 = vld [vmem:[%s2068_s3] ss:$0 sm:$0xff]  ;;  %s1811_s3 = smov 64  }
   0xb   :  { %1660 = vmatpush3.xpose.msk.msra.mxu0 %vm34_vm0, %v31_v3 }
   0xc   :  { %1661 = vmatprep.subr.msk.mxu0 %vm34_vm0, %v30_v5 }
   0xf   :  { %1662 = vmatpush3.xpose.msk.msra.mxu0 %vm34_vm0, %v30_v5 }
  0x10   :  { %1663 = vmatprep.subr.msk.mxu0 %vm34_vm0, %v29_v6 }
  0x13   :  { %1664 = vmatpush3.xpose.msk.msra.mxu0 %vm34_vm0, %v29_v6 }
  0x14   :  { %1665 = vmatprep.subr.msk.mxu0 %vm34_vm0, %v28_v7 }
  0x17   :  { %1666 = vmatpush3.xpose.msk.msra.mxu0 %vm34_vm0, %v28_v7 }
  0x18   :  { %1667 = vmatprep.subr.msk.mxu0 %vm34_vm0, %v27_v8 }
  0x1b   :  { %1668 = vmatpush3.xpose.msk.msra.mxu0 %vm34_vm0, %v27_v8 }
  0x1c   :  { %1669 = vmatprep.subr.msk.mxu0 %vm34_vm0, %v26_v9 }
  0x1f   :  { %1670 = vmatpush3.xpose.msk.msra.mxu0 %vm34_vm0, %v26_v9 }
  0x20   :  { %1738 = vmatprep.subr.mxu0 %v1806_v17 }
  0x22   :  { %1672 = vmatmul.mubr.msk.f32.vlgmr.msra.gmra.mxu0 %vm34_vm0, %v19_v10 }
  0x23   :  { %1674 = vmatprep.mubr.msk.f32.mxu0 %vm34_vm0, %v20_v11 }
  0x26   :  { %1675 = vmatmul.mubr.msk.f32.gmra.mxu0 %vm34_vm0, %v21_v12 }
  0x27   :  { %1677 = vmatprep.mubr.msk.f32.mxu0 %vm34_vm0, %v22_v13 }
  0x2a   :  { %1678 = vmatmul.mubr.msk.f32.gmra.mxu0 %vm34_vm0, %v23_v14 }
  0x2b   :  { %1680 = vmatprep.mubr.msk.f32.mxu0 %vm34_vm0, %v24_v15 }
  0x2e   :  { %1681 = vmatmul.mubr.msk.f32.gmra.mxu0 %vm34_vm0, %v25_v16 }
  0x2f   :  { %1740 = vmatprep.mubr.msk.f32.mxu0 %vm1807_vm1, %v1806_v17 }
  0x78   :  { %v204_v22 = vpop.permute.xlu0 %203 }
  0xe2   :  { %v1673_v18 = vpop.f32.mrf.mxu0 }
  0xe3   :  { %v1937_v36 = vadd.f32 %v1673_v18, %v1597_v32 }
  0xe4   :  { %v149_v19 = vpop.f32.mrf.mxu0 }
  0xe5   :  { %v193_v33 = vadd.f32 %v1597_v32, %v149_v19 }
  0xe6   :  { %v1676_v20 = vpop.f32.mrf.mxu0 }
  0xe7   :  { %v1958_v39 = vadd.f32 %v1676_v20, %v1597_v32 }
  0xe8   :  { %v159_v21 = vpop.f32.mrf.mxu0 }
  0xe9   :  { %v1950_v38 = vadd.f32 %v1597_v32, %v159_v21 }
  0xea   :  { %v1679_v23 = vpop.f32.mrf.mxu0 }
  0xeb   :  { %v207_v24 = vadd.f32 %v1679_v23, %v204_v22 }
  0xec   :  { %v169_v25 = vpop.f32.mrf.mxu0 }
  0xed   :  { %v206_v26 = vadd.f32 %v204_v22, %v169_v25  ;;  %289 = vrot.lane.b32.xlu1 %v207_v24, %s1808_s1 }
  0xee   :  { %v1682_v27 = vpop.f32.mrf.mxu0 }
  0xef   :  { %211 = vrot.lane.b32.xlu0 %v206_v26, %s1808_s1  ;;  %v209_v29 = vadd.f32 %v1682_v27, %v204_v22 }
  0xf0   :  { %v179_v28 = vpop.f32.mrf.mxu0 }
  0xf1   :  { %v208_v30 = vadd.f32 %v204_v22, %v179_v28 }
  0xf3   :  { %445 = vrot.lane.b32.xlu0 %v209_v29, %s1808_s1  ;;  %367 = vrot.lane.b32.xlu1 %v208_v30, %s1808_s1 }
 0x15f   :  { %v1932_v34 = vpop.permute.xlu1 %289 }
 0x161   :  { %v1924_v31 = vpop.permute.xlu0 %211 }
 0x162   :  { %1684 = vmatpush3.xpose.msk.msra.mxu1 %vm34_vm0, %v1924_v31 }
 0x163   :  { %1688 = vmatprep.subr.mxu1 %v1806_v17 }
 0x165   :  { %1686 = vmatmul.mubr.msk.f32.vlgmr.msra.gmra.mxu1 %vm34_vm0, %v193_v33  ;;  %v446_v35 = vpop.permute.xlu0 %445  ;;  %v1942_v37 = vpop.permute.xlu1 %367 }
 0x166   :  { %1689 = vmatpush3.xpose.msk.msra.mxu1 %vm34_vm0, %v1932_v34  ;;  %1739 = vmatpush3.msra.mxu0 %v446_v35 }
 0x167   :  { %1690 = vmatprep.mubr.msk.f32.mxu1 %vm1807_vm1, %v1806_v17  ;;  %1693 = vmatprep.subr.mxu1 %v1806_v17 }
 0x169   :  { %1691 = vmatmul.mubr.msk.f32.vlgmr.msra.gmra.mxu1 %vm34_vm0, %v1937_v36 }
 0x16a   :  { %1694 = vmatpush3.xpose.msk.msra.mxu1 %vm34_vm0, %v1942_v37  ;;  %1695 = vmatprep.mubr.msk.f32.mxu1 %vm1807_vm1, %v1806_v17 }
 0x16b   :  { %1698 = vmatprep.subr.mxu1 %v1806_v17 }
 0x16d   :  { %1696 = vmatmul.mubr.msk.f32.vlgmr.msra.gmra.mxu1 %vm34_vm0, %v1950_v38 }
 0x16e   :  { %1699 = vmatpush3.xpose.msk.msra.mxu1 %vm34_vm0, %v446_v35  ;;  %1700 = vmatprep.mubr.msk.f32.mxu1 %vm1807_vm1, %v1806_v17 }
 0x16f   :  { %1703 = vmatprep.subr.mxu1 %v1806_v17 }
 0x171   :  { %1701 = vmatmul.mubr.msk.f32.vlgmr.msra.gmra.mxu1 %vm34_vm0, %v1958_v39 }
 0x172   :  { %1704 = vmatpush3.msra.mxu1 %v193_v33  ;;  %1705 = vmatprep.mubr.msk.f32.mxu1 %vm1807_vm1, %v1806_v17 }
 0x173   :  { %1708 = vmatprep.subr.mxu1 %v1806_v17 }
 0x225   :  { %v284_v40 = vpop.f32.mrf.mxu1 }
 0x226   :  { %v522_v41 = vmul.f32 0.17677669, %v284_v40 }
 0x227   :  { %v1687_v42 = vpop.f32.mrf.mxu1 }
 0x228   :  { %v527_v43 = vsel %vm526_vm2, %v522_v41, -inf }
 0x229   :  { %v362_v44 = vpop.f32.mrf.mxu1  ;;  %528 = vmax.xlane.f32.xlu1 %v527_v43  ;;  %v863_v56 = vrot.slane %v527_v43, 4 }
 0x22a   :  { %v1967_v45 = vmul.f32 0.17677669, %v362_v44 }
 0x22b   :  { %v1692_v46 = vpop.f32.mrf.mxu1  ;;  %v864_v57 = vmax.f32 %v527_v43, %v863_v56 }
 0x22c   :  { %v530_v47 = vsel %vm526_vm2, %v1967_v45, -inf }
 0x22d   :  { %531 = vmax.xlane.f32.xlu0 %v530_v47  ;;  %v440_v48 = vpop.f32.mrf.mxu1  ;;  %v865_v59 = vrot.slane %v864_v57, 2  ;;  %v869_v62 = vrot.slane %v530_v47, 4 }
 0x22e   :  { %v524_v49 = vmul.f32 0.17677669, %v440_v48 }
 0x22f   :  { %v1697_v50 = vpop.f32.mrf.mxu1  ;;  %v866_v63 = vmax.f32 %v864_v57, %v865_v59  ;;  %v870_v2 = vmax.f32 %v530_v47, %v869_v62 }
 0x230   :  { %v533_v51 = vsel %vm526_vm2, %v524_v49, -inf }
 0x231   :  { %534 = vmax.xlane.f32.xlu0 %v533_v51  ;;  %v518_v52 = vpop.f32.mrf.mxu1  ;;  %v875_v58 = vrot.slane %v533_v51, 4  ;;  %v867_v3 = vrot.slane %v866_v63, 1  ;;  %v871_v6 = vrot.slane %v870_v2, 2 }
 0x232   :  { %v525_v53 = vmul.f32 0.17677669, %v518_v52 }
 0x233   :  { %v1702_v54 = vpop.f32.mrf.mxu1  ;;  %v876_v60 = vmax.f32 %v533_v51, %v875_v58  ;;  %v868_v7 = vmax.f32 %v866_v63, %v867_v3  ;;  %v872_v12 = vmax.f32 %v870_v2, %v871_v6 }
 0x234   :  { %v536_v55 = vsel %vm526_vm2, %v525_v53, -inf }
 0x235   :  { %537 = vmax.xlane.f32.xlu1 %v536_v55  ;;  %v881_v61 = vrot.slane %v536_v55, 4  ;;  %v877_v0 = vrot.slane %v876_v60, 2  ;;  %v887_v14 = vsub.f32 %v522_v41, %v868_v7  ;;  %v873_v20 = vrot.slane %v872_v12, 1 }
 0x237   :  { %v882_v1 = vmax.f32 %v536_v55, %v881_v61  ;;  %v878_v4 = vmax.f32 %v876_v60, %v877_v0  ;;  %v891_v22 = vmul.f32 1.442695, %v887_v14  ;;  %v874_v27 = vmax.f32 %v872_v12, %v873_v20 }
 0x239   :  { %v883_v5 = vrot.slane %v882_v1, 2  ;;  %v879_v8 = vrot.slane %v878_v4, 1  ;;  %v888_v35 = vsub.f32 %v1967_v45, %v874_v27 }
 0x23b   :  { %v884_v9 = vmax.f32 %v882_v1, %v883_v5  ;;  %v880_v15 = vmax.f32 %v878_v4, %v879_v8  ;;  %v893_v43 = vmul.f32 1.442695, %v888_v35 }
 0x23d   :  { %v885_v16 = vrot.slane %v884_v9, 1  ;;  %v889_v23 = vsub.f32 %v524_v49, %v880_v15 }
 0x23f   :  { %v886_v24 = vmax.f32 %v884_v9, %v885_v16  ;;  %v895_v29 = vmul.f32 1.442695, %v889_v23 }
 0x241   :  { %v890_v30 = vsub.f32 %v525_v53, %v886_v24 }
 0x2b2   :  { %v529_v10 = vpop.xlane.xlu1 %528 }
 0x2b3   :  { %v539_v11 = vsub.f32 %v522_v41, %v529_v10  ;;  %v897_v41 = vmul.f32 1.442695, %v890_v30 }
 0x2b5   :  { %v543_v13 = vmul.f32 1.442695, %v539_v11 }
 0x2b6   :  { %v532_v18 = vpop.xlane.xlu0 %531 }
 0x2b7   :  { %1751 = vpow2.f32 %v543_v13  ;;  %v540_v19 = vsub.f32 %v1967_v45, %v532_v18 }
 0x2b9   :  { %v545_v21 = vmul.f32 1.442695, %v540_v19 }
 0x2ba   :  { %v535_v25 = vpop.xlane.xlu0 %534 }
 0x2bb   :  { %1753 = vpow2.f32 %v545_v21  ;;  %v541_v26 = vsub.f32 %v524_v49, %v535_v25 }
 0x2bc   :  { %1755 = vpow2.f32 %v891_v22 }
 0x2bd   :  { %v547_v28 = vmul.f32 1.442695, %v541_v26 }
 0x2be   :  { %v538_v32 = vpop.xlane.xlu1 %537 }
 0x2bf   :  { %1757 = vpow2.f32 %v547_v28  ;;  %v542_v33 = vsub.f32 %v525_v53, %v538_v32 }
 0x2c0   :  { %1759 = vpow2.f32 %v895_v29 }
 0x2c1   :  { %v549_v40 = vmul.f32 1.442695, %v542_v33 }
 0x2c3   :  { %1761 = vpow2.f32 %v549_v40 }
 0x2c4   :  { %v1975_v42 = vpop.eup %1751  ;;  %1763 = vpow2.f32 %v897_v41 }
 0x2c5   :  { %v551_v44 = vsel %vm526_vm2, %v1975_v42, 0.0  ;;  %1765 = vpow2.f32 %v893_v43 }
 0x2c6   :  { %552 = vadd.xlane.f32.xlu0 %v551_v44 }
 0x2c8   :  { %v1979_v46 = vpop.eup %1753 }
 0x2c9   :  { %v554_v47 = vsel %vm526_vm2, %v1979_v46, 0.0  ;;  %v1756_v45 = vpop.eup %1755 }
 0x2ca   :  { %555 = vadd.xlane.f32.xlu1 %v554_v47  ;;  %v899_v50 = vsel %vm526_vm2, %v1756_v45, 0.0 }
 0x2cb   :  { %v900_v54 = vrot.slane %v899_v50, 4 }
 0x2cc   :  { %v1983_v48 = vpop.eup %1757 }
 0x2cd   :  { %v557_v49 = vsel %vm526_vm2, %v1983_v48, 0.0  ;;  %v1760_v51 = vpop.eup %1759  ;;  %v901_v58 = vadd.f32 %v900_v54, %v899_v50 }
 0x2ce   :  { %558 = vadd.xlane.f32.xlu0 %v557_v49  ;;  %v913_v55 = vsel %vm526_vm2, %v1760_v51, 0.0  ;;  %v1364_v49 = vlaneseq }
 0x2cf   :  { %v914_v59 = vrot.slane %v913_v55, 4  ;;  %v902_v62 = vrot.slane %v901_v58, 2 }
 0x2d0   :  { %v1988_v52 = vpop.eup %1761 }
 0x2d1   :  { %v560_v53 = vsel %vm526_vm2, %v1988_v52, 0.0  ;;  %v1764_v56 = vpop.eup %1763  ;;  %v915_v63 = vadd.f32 %v914_v59, %v913_v55  ;;  %v903_v2 = vadd.f32 %v902_v62, %v901_v58  ;;  %v1365_v55 = vshrl.u32 %v1364_v49, 7 }
 0x2d2   :  { %561 = vadd.xlane.f32.xlu1 %v560_v53  ;;  %v1766_v57 = vpop.eup %1765  ;;  %v920_v60 = vsel %vm526_vm2, %v1764_v56, 0.0 }
 0x2d3   :  { %v906_v61 = vsel %vm526_vm2, %v1766_v57, 0.0  ;;  %v921_v0 = vrot.slane %v920_v60, 4  ;;  %v916_v3 = vrot.slane %v915_v63, 2  ;;  %v904_v6 = vrot.slane %v903_v2, 1 }
 0x2d4   :  { %v907_v1 = vrot.slane %v906_v61, 4 }
 0x2d5   :  { %v922_v4 = vadd.f32 %v921_v0, %v920_v60  ;;  %v917_v7 = vadd.f32 %v916_v3, %v915_v63  ;;  %v905_v10 = vadd.f32 %v904_v6, %v903_v2 }
 0x2d6   :  { %v908_v5 = vadd.f32 %v907_v1, %v906_v61 }
 0x2d7   :  { %v923_v8 = vrot.slane %v922_v4, 2  ;;  %v918_v11 = vrot.slane %v917_v7, 1  ;;  %1767 = vrcp.f32 %v905_v10 }
 0x2d8   :  { %v909_v9 = vrot.slane %v908_v5, 2 }
 0x2d9   :  { %v924_v12 = vadd.f32 %v923_v8, %v922_v4  ;;  %v919_v14 = vadd.f32 %v918_v11, %v917_v7 }
 0x2da   :  { %v910_v13 = vadd.f32 %v909_v9, %v908_v5 }
 0x2db   :  { %v925_v15 = vrot.slane %v924_v12, 1  ;;  %1769 = vrcp.f32 %v919_v14 }
 0x2dc   :  { %v911_v16 = vrot.slane %v910_v13, 1 }
 0x2dd   :  { %v926_v18 = vadd.f32 %v925_v15, %v924_v12 }
 0x2de   :  { %v912_v19 = vadd.f32 %v911_v16, %v910_v13 }
 0x2df   :  { %1771 = vrcp.f32 %v926_v18 }
 0x2e0   :  { %1773 = vrcp.f32 %v912_v19 }
 0x2e4   :  { %v1768_v20 = vpop.eup %1767 }
 0x2e5   :  { %v931_v21 = vmul.f32 %v1768_v20, %v1756_v45  ;;  %v1809_v45 = vmov 1983009808  }
 0x2e8   :  { %v1770_v22 = vpop.eup %1769 }
 0x2e9   :  { %v933_v23 = vmul.f32 %v1770_v22, %v1760_v51 }
 0x2ec   :  { %v1772_v24 = vpop.eup %1771 }
 0x2ed   :  { %v1774_v25 = vpop.eup %1773  ;;  %v934_v26 = vmul.f32 %v1772_v24, %v1764_v56 }
 0x2ee   :  { %v932_v27 = vmul.f32 %v1774_v25, %v1766_v57 }
 0x2fb   :  { %935 = vxpose.xlu0.b32.start.end [1/1] (short) (narrow) %v931_v21, 8 }
 0x2ff   :  { %999 = vxpose.xlu0.b32.start.end [1/1] (short) (narrow) %v933_v23, 8 }
 0x303   :  { %1031 = vxpose.xlu0.b32.start.end [1/1] (short) (narrow) %v934_v26, 8 }
 0x305   :  { %967 = vxpose.xlu1.b32.start.end [1/1] (short) (narrow) %v932_v27, 8 }
 0x34f   :  { %v553_v28 = vpop.xlane.xlu0 %552 }
 0x350   :  { %1775 = vrcp.f32 %v553_v28 }
 0x353   :  { %v556_v29 = vpop.xlane.xlu1 %555 }
 0x354   :  { %1777 = vrcp.f32 %v556_v29 }
 0x357   :  { %v559_v30 = vpop.xlane.xlu0 %558 }
 0x358   :  { %1779 = vrcp.f32 %v559_v30 }
 0x35b   :  { %v562_v32 = vpop.xlane.xlu1 %561 }
 0x35c   :  { %1781 = vrcp.f32 %v562_v32 }
 0x35d   :  { %v1776_v33 = vpop.eup %1775 }
 0x35e   :  { %v567_v35 = vmul.f32 %v1776_v33, %v1975_v42 }
 0x360   :  { %1706 = vmatmul.mubr.msk.f32.vlgmr.msra.gmra.mxu1 %vm526_vm2, %v567_v35 }
 0x361   :  { %v1778_v40 = vpop.eup %1777  ;;  %1709 = vmatpush3.msra.mxu1 %v1937_v36  ;;  %1710 = vmatprep.mubr.msk.f32.mxu1 %vm1807_vm1, %v1806_v17 }
 0x362   :  { %1713 = vmatprep.subr.mxu1 %v1806_v17  ;;  %v568_v41 = vmul.f32 %v1778_v40, %v1979_v46 }
 0x364   :  { %1711 = vmatmul.mubr.msk.f32.vlgmr.msra.gmra.mxu1 %vm526_vm2, %v568_v41 }
 0x365   :  { %v1780_v43 = vpop.eup %1779  ;;  %1714 = vmatpush3.msra.mxu1 %v1950_v38  ;;  %1715 = vmatprep.mubr.msk.f32.mxu1 %vm1807_vm1, %v1806_v17 }
 0x366   :  { %1718 = vmatprep.subr.mxu1 %v1806_v17  ;;  %v569_v42 = vmul.f32 %v1780_v43, %v1983_v48  ;;  %v1362_v48 = vunpack.c.l.s4 %v1809_v45 }
 0x368   :  { %1716 = vmatmul.mubr.msk.f32.vlgmr.msra.gmra.mxu1 %vm526_vm2, %v569_v42  ;;  %v1363_v54 = vunpack.c.0.s8 %v1362_v48 }
 0x369   :  { %v1782_v36 = vpop.eup %1781  ;;  %1719 = vmatpush3.msra.mxu1 %v1958_v39  ;;  %1720 = vmatprep.mubr.msk.f32.mxu1 %vm1807_vm1, %v1806_v17 }
 0x36a   :  { %1723 = vmatprep.subr.mxu1 %v1806_v17  ;;  %v570_v44 = vmul.f32 %v1782_v36, %v1988_v52  ;;  %v1810_v52 = vmov 1934713408   ;;  %v1366_v60 = vsub.s32 %v1363_v54, %v1365_v55 }
 0x36b   :  { %v1394_v53 = vunpack.c.l.s4 %v1810_v52 }
 0x36c   :  { %1721 = vmatmul.mubr.msk.f32.vlgmr.msra.gmra.mxu1 %vm526_vm2, %v570_v44 }
 0x36d   :  { %1724 = vmatpush3.msra.mxu1 %v1924_v31  ;;  %1725 = vmatprep.mubr.msk.f32.mxu1 %vm1807_vm1, %v1806_v17  ;;  %v1395_v58 = vunpack.c.0.s8 %v1394_v53 }
 0x36e   :  { %1728 = vmatprep.subr.mxu1 %v1806_v17 }
 0x36f   :  { %v1398_v1 = vsub.s32 %v1395_v58, %v1365_v55 }
 0x377   :  { %v951_v38 = vpop.trf.xlu0 }
 0x378   :  { %1726 = vmatmul.mubr.msk.f32.vlgmr.msra.gmra.mxu1 %vm526_vm2, %v951_v38 }
 0x379   :  { %1729 = vmatpush3.msra.mxu1 %v1932_v34  ;;  %1730 = vmatprep.mubr.msk.f32.mxu1 %vm1807_vm1, %v1806_v17 }
 0x37a   :  { %1733 = vmatprep.subr.mxu1 %v1806_v17 }
 0x37b   :  { %v1015_v39 = vpop.trf.xlu0 }
 0x37f   :  { %v1047_v46 = vpop.trf.xlu0 }
 0x380   :  { %1741 = vmatmul.mubr.msk.f32.vlgmr.msra.gmra.mxu0 %vm526_vm2, %v1047_v46 }
 0x381   :  { %v983_v31 = vpop.trf.xlu1 }
 0x382   :  { %1731 = vmatmul.mubr.msk.f32.vlgmr.msra.gmra.mxu1 %vm526_vm2, %v983_v31 }
 0x383   :  { %1734 = vmatpush3.msra.mxu1 %v1942_v37  ;;  %1735 = vmatprep.mubr.msk.f32.mxu1 %vm1807_vm1, %v1806_v17 }
 0x386   :  { %1736 = vmatmul.mubr.msk.f32.vlgmr.msra.gmra.mxu1 %vm526_vm2, %v1015_v39 }
 0x420   :  { %v640_v34 = vpop.f32.mrf.mxu1 }
 0x422   :  { %v1707_v47 = vpop.f32.mrf.mxu1 }
 0x424   :  { %v713_v50 = vpop.f32.mrf.mxu1 }
 0x426   :  { %v1712_v51 = vpop.f32.mrf.mxu1 }
 0x428   :  { %v786_v56 = vpop.f32.mrf.mxu1 }
 0x429   :  { %v1359_v37 = vcombine.low %v640_v34, %v786_v56  ;;  %v1360_v59 = vcombine.high %v640_v34, %v786_v56 }
 0x42a   :  { %v1717_v57 = vpop.f32.mrf.mxu1 }
 0x42b   :  { %v1367_v2 = vrot.slane %v1359_v37, %v1366_v60  ;;  %v1374_v3 = vrot.slane %v1360_v59, %v1366_v60 }
 0x42c   :  { %v859_v61 = vpop.f32.mrf.mxu1 }
 0x42d   :  { %v1375_v62 = vcombine.low %v713_v50, %v859_v61  ;;  %v1376_v63 = vcombine.high %v713_v50, %v859_v61 }
 0x42e   :  { %v1722_v0 = vpop.f32.mrf.mxu1 }
 0x42f   :  { %v1383_v4 = vrot.slane %v1375_v62, %v1366_v60  ;;  %v1390_v5 = vrot.slane %v1376_v63, %v1366_v60 }
 0x431   :  { %v1391_v6 = vcombine.low %v1367_v2, %v1383_v4  ;;  %v1392_v7 = vcombine.high %v1367_v2, %v1383_v4  ;;  %v1407_v8 = vcombine.low %v1374_v3, %v1390_v5  ;;  %v1408_v9 = vcombine.high %v1374_v3, %v1390_v5 }
 0x433   :  { %v1422_v10 = vrot.slane %v1408_v9, %v1398_v1  ;;  %v1406_v11 = vrot.slane %v1392_v7, %v1398_v1  ;;  %v1415_v12 = vrot.slane %v1407_v8, %v1398_v1  ;;  %v1399_v13 = vrot.slane %v1391_v6, %v1398_v1 }
 0x435   :  { %1444 = vrot.lane.b32.xlu0 %v1422_v10, %s1811_s3  ;;  %1432 = vrot.lane.b32.xlu1 %v1406_v11, %s1811_s3  ;;  %v1425_v14 = vcombine.high %v1415_v12, %v1806_v17  ;;  %v1423_v15 = vcombine.high %v1399_v13, %v1806_v17  ;;  %v1426_v19 = vcombine.high %v1422_v10, %v1806_v17 }
 0x436   :  { %v1424_v20 = vcombine.high %v1406_v11, %v1806_v17 }
 0x438   :  { %v1133_v16 = vpop.f32.mrf.mxu1 }
 0x439   :  { %1440 = vrot.lane.b32.xlu0 %v1425_v14, %s1805_s25  ;;  %1428 = vrot.lane.b32.xlu1 %v1423_v15, %s1805_s25 }
 0x43a   :  { %v1727_v18 = vpop.f32.mrf.mxu1 }
 0x43d   :  { %1448 = vrot.lane.b32.xlu0 %v1426_v19, %s1808_s1  ;;  %1436 = vrot.lane.b32.xlu1 %v1424_v20, %s1808_s1 }
 0x440   :  { %v1355_v21 = vpop.f32.mrf.mxu0 }
 0x442   :  { %v1207_v22 = vpop.f32.mrf.mxu1  ;;  %v1742_v23 = vpop.f32.mrf.mxu0 }
 0x443   :  { %v1480_v25 = vcombine.low %v1207_v22, %v1355_v21  ;;  %v1481_v26 = vcombine.high %v1207_v22, %v1355_v21 }
 0x444   :  { %v1732_v24 = vpop.f32.mrf.mxu1 }
 0x445   :  { %v1488_v32 = vrot.slane %v1480_v25, %v1366_v60  ;;  %v1495_v33 = vrot.slane %v1481_v26, %v1366_v60 }
 0x446   :  { %v1281_v27 = vpop.f32.mrf.mxu1 }
 0x447   :  { %v1464_v28 = vcombine.low %v1133_v16, %v1281_v27  ;;  %v1465_v29 = vcombine.high %v1133_v16, %v1281_v27 }
 0x448   :  { %v1737_v30 = vpop.f32.mrf.mxu1 }
 0x449   :  { %v1472_v35 = vrot.slane %v1464_v28, %v1366_v60  ;;  %v1479_v40 = vrot.slane %v1465_v29, %v1366_v60 }
 0x44b   :  { %v1496_v41 = vcombine.low %v1472_v35, %v1488_v32  ;;  %v1497_v43 = vcombine.high %v1472_v35, %v1488_v32  ;;  %v1513_v42 = vcombine.high %v1479_v40, %v1495_v33  ;;  %v1512_v36 = vcombine.low %v1479_v40, %v1495_v33 }
 0x44d   :  { %v1527_v44 = vrot.slane %v1513_v42, %v1398_v1  ;;  %v1511_v38 = vrot.slane %v1497_v43, %v1398_v1  ;;  %v1504_v39 = vrot.slane %v1496_v41, %v1398_v1  ;;  %v1520_v34 = vrot.slane %v1512_v36, %v1398_v1 }
 0x44f   :  { %1549 = vrot.lane.b32.xlu0 %v1527_v44, %s1811_s3  ;;  %1537 = vrot.lane.b32.xlu1 %v1511_v38, %s1811_s3  ;;  %v1531_v46 = vcombine.high %v1527_v44, %v1806_v17  ;;  %v1528_v31 = vcombine.high %v1504_v39, %v1806_v17  ;;  %v1530_v47 = vcombine.high %v1520_v34, %v1806_v17 }
 0x450   :  { %v1529_v45 = vcombine.high %v1511_v38, %v1806_v17 }
 0x453   :  { %1553 = vrot.lane.b32.xlu0 %v1531_v46, %s1808_s1  ;;  %1533 = vrot.lane.b32.xlu1 %v1528_v31, %s1805_s25 }
 0x457   :  { %1545 = vrot.lane.b32.xlu1 %v1530_v47, %s1805_s25  ;;  %s1573_s25 = sshll.u32 %s1812_s24, 4  ;;  %s1574_s25 = int_to_ptr.vmem [resolvable:$true] %s1573_s25 }
 0x458   :  { %s1783_s26 = scalar_lea.vmem %s1574_s25, 256  ;;  %p1788_p1 = scmp.lt.s32.totalorder %s1574_s25, %s1574_s25 }
 0x459   :  { %p1784_p0 = scmp.ne.s32.totalorder %s1574_s25, %s1783_s26  ;;  %p1789_p2 = scmp.lt.s32.totalorder %s1783_s26, %s1783_s26 }
 0x45b   :  { %1541 = vrot.lane.b32.xlu1 %v1529_v45, %s1808_s1  ;;  %p1790_p3 = por %p1789_p2, %p1788_p1 }
 0x45d   :  { %p1791_p4 = pnand %p1790_p3, %p1784_p0 }
 0x4a7   :  { %v1445_v48 = vpop.permute.xlu0 %1444  ;;  %v1433_v49 = vpop.permute.xlu1 %1432 }
 0x4ab   :  { %v1441_v50 = vpop.permute.xlu0 %1440  ;;  %v1429_v51 = vpop.permute.xlu1 %1428 }
 0x4ac   :  { %v1456_v52 = vsel %vm34_vm0, %v1415_v12, %v1441_v50  ;;  %v1451_v53 = vsel %vm34_vm0, %v1399_v13, %v1429_v51 }
 0x4ad   :  { %v1457_v54 = vsel %vm1452_vm3, %v1456_v52, %v1445_v48  ;;  %v1453_v56 = vsel %vm1452_vm3, %v1451_v53, %v1433_v49 }
 0x4af   :  { %v1449_v55 = vpop.permute.xlu0 %1448  ;;  %v1437_v57 = vpop.permute.xlu1 %1436 }
 0x4b0   :  { %v1458_v17 = vsel %vm1454_vm4, %v1457_v54, %v1449_v55  ;;  %v1455_v58 = vsel %vm1454_vm4, %v1453_v56, %v1437_v57 }
 0x4b1   :  { %v1461_v37 = vcombine.low %v1455_v58, %v1458_v17 }
 0x4b3   :  { %1463 = vst [vmem:[#allocation2] sm:$0xff] %v1461_v37 }
 0x4c1   :  { %v1538_v59 = vpop.permute.xlu1 %1537  ;;  %v1550_v61 = vpop.permute.xlu0 %1549 }
 0x4c5   :  { %v1534_v60 = vpop.permute.xlu1 %1533  ;;  %v1554_v2 = vpop.permute.xlu0 %1553 }
 0x4c6   :  { %v1556_v63 = vsel %vm34_vm0, %v1504_v39, %v1534_v60 }
 0x4c7   :  { %v1557_v3 = vsel %vm1452_vm3, %v1556_v63, %v1538_v59 }
 0x4c9   :  { %v1546_v62 = vpop.permute.xlu1 %1545 }
 0x4ca   :  { %v1559_v0 = vsel %vm34_vm0, %v1520_v34, %v1546_v62 }
 0x4cb   :  { %v1560_v1 = vsel %vm1452_vm3, %v1559_v0, %v1550_v61 }
 0x4cc   :  { %v1561_v5 = vsel %vm1454_vm4, %v1560_v1, %v1554_v2 }
 0x4cd   :  { %v1542_v4 = vpop.permute.xlu1 %1541 }
 0x4ce   :  { %v1558_v6 = vsel %vm1454_vm4, %v1557_v3, %v1542_v4 }
 0x4cf   :  { %v1564_v7 = vcombine.low %v1558_v6, %v1561_v5 }
 0x4d1   :  { %1566 = vst [vmem:[#allocation2 + $0x8] sm:$0xff] %v1564_v7 }
 0x4d2   :  { %1794 = shalt.err (!%p1791_p4)
}
 0x4d3   :  { %1576 = dma.vmem_to_hbm [thread:$0]  %s1574_s25, 256, %s2069_s4, [#allocation3]  }
 0x4d4   :  { %1803 = dma.done.wait [#allocation3], 256  }
 0x4d5   :  { %1804 = vsyncadd [#allocation3], 4294967040 }
 0x4d6   :  { %1580 = vsyncpa [#allocation3], 1 }

</bundles_post_ra>
